<compile_context>
chip_gen: v6e
topology: v6e:2x2x1
jax: 0.10.0
libtpu: 0.0.40
codegen_flags: <defaults>
</compile_context>

<pallas_src>
import functools

import jax
import jax.numpy as jnp
from jax.experimental import pallas as pl
from jax.experimental.pallas import tpu as pltpu


def _round_up(x, m):
    return ((x + m - 1) // m) * m


def _pick_batch_tile(B, T, *, target_rows=512, min_rows_per_step=128):
    """Batches per grid step for the dense kernels.

    Fill the MXU (bt*T ~ target_rows), keep >= 2 grid steps for v7x megacore when
    that does not starve the MXU, and pick a divisor of B so no batch padding or
    output slicing (extra HBM passes) is ever needed.
    """
    bt = max(1, min(B, max(1, target_rows // max(T, 1))))
    if bt == B and B >= 2 and (B // 2) * T >= min_rows_per_step:
        bt = max(1, B // 2)
    while B % bt:
        bt -= 1
    return bt


def _pick_attn_tile(B, *, target_bt=8):
    """Batches per grid step for attention (VMEM-bound block); prefer >= 2 steps."""
    bt = max(1, min(target_bt, B))
    if bt == B and B >= 2:
        bt = max(1, B // 2)
    while B % bt:
        bt -= 1
    return bt


# -----------------------------------------------------------------------------
# Kernel 1: encoder dense + fused masked row-sum (for enc_state)
#   x: (B, T, E) bf16   w: (E, H) bf16   b: (1, H) f32   lengths: (B, 1, 1) i32
#   mem = tanh(x @ w + b)  (bf16),  sums[b] = sum_t mask[b,t] * mem_f32[b,t,:]
# -----------------------------------------------------------------------------
def _enc_dense_kernel(len_ref, x_ref, w_ref, b_ref, mem_ref, sum_ref):
    bt, T, E = x_ref.shape
    H = w_ref.shape[1]
    # Collapse bt batches into one (bt*T, E) MXU pass (T sublane-aligned => free).
    acc = jnp.dot(x_ref[...].reshape(bt * T, E), w_ref[...],
                  preferred_element_type=jnp.float32)
    h = jnp.tanh(acc.reshape(bt, T, H) + b_ref[...])          # f32 (bt, T, H)
    mem_ref[...] = h.astype(mem_ref.dtype)
    pos = jax.lax.broadcasted_iota(jnp.int32, (bt, T, 1), 1)
    mask = (pos < len_ref[...]).astype(jnp.float32)            # (bt, T, 1)
    sum_ref[...] = jnp.sum(h * mask, axis=1, keepdims=True)    # (bt, 1, H)


def encoder_dense(x_bte, w, b, lengths, *, out_dtype=jnp.bfloat16):
    B, T, E = x_bte.shape
    H = w.shape[1]
    bt = _pick_batch_tile(B, T)
    x = x_bte.astype(jnp.bfloat16)
    w = w.astype(jnp.bfloat16)
    b = b.astype(jnp.float32)
    ln3 = lengths.astype(jnp.int32).reshape(B, 1, 1)
    mem, sums = pl.pallas_call(
        _enc_dense_kernel,
        out_shape=(
            jax.ShapeDtypeStruct((B, T, H), out_dtype),
            jax.ShapeDtypeStruct((B, 1, H), jnp.float32),
        ),
        grid_spec=pltpu.PrefetchScalarGridSpec(
            num_scalar_prefetch=0,
            grid=(B // bt,),
            in_specs=[
                pl.BlockSpec((bt, 1, 1), lambda i: (i, 0, 0)),
                pl.BlockSpec((bt, T, E), lambda i: (i, 0, 0)),
                pl.BlockSpec((E, H), lambda i: (0, 0)),
                pl.BlockSpec((1, H), lambda i: (0, 0)),
            ],
            out_specs=[
                pl.BlockSpec((bt, T, H), lambda i: (i, 0, 0)),
                pl.BlockSpec((bt, 1, H), lambda i: (i, 0, 0)),
            ],
        ),
        compiler_params=pltpu.CompilerParams(dimension_semantics=("parallel",)),
    )(ln3, x, w, b)
    return mem, sums[:, 0, :]


# -----------------------------------------------------------------------------
# Kernel 2: decoder query projection with per-batch init-state injection
#   o[b] = tanh(x[b] @ w + b + state[b]);  bt batches folded per MXU pass.
# -----------------------------------------------------------------------------
def _dec_query_kernel(x_ref, w_ref, b_ref, s_ref, o_ref):
    bt, T, E = x_ref.shape
    H = w_ref.shape[1]
    acc = jnp.dot(x_ref[...].reshape(bt * T, E), w_ref[...],
                  preferred_element_type=jnp.float32).reshape(bt, T, H)
    o_ref[...] = jnp.tanh(acc + b_ref[...] + s_ref[...]).astype(o_ref.dtype)


def decoder_query(x_bte, w, b, state_bh, *, out_dtype=jnp.bfloat16):
    B, T, E = x_bte.shape
    H = w.shape[1]
    bt = _pick_batch_tile(B, T)
    x = x_bte.astype(jnp.bfloat16)
    w = w.astype(jnp.bfloat16)
    b = b.astype(jnp.float32)
    s = state_bh.astype(jnp.float32).reshape(B, 1, H)
    return pl.pallas_call(
        _dec_query_kernel,
        out_shape=jax.ShapeDtypeStruct((B, T, H), out_dtype),
        grid_spec=pltpu.PrefetchScalarGridSpec(
            num_scalar_prefetch=0,
            grid=(B // bt,),
            in_specs=[
                pl.BlockSpec((bt, T, E), lambda i: (i, 0, 0)),
                pl.BlockSpec((E, H), lambda i: (0, 0)),
                pl.BlockSpec((1, H), lambda i: (0, 0)),
                pl.BlockSpec((bt, 1, H), lambda i: (i, 0, 0)),
            ],
            out_specs=pl.BlockSpec((bt, T, H), lambda i: (i, 0, 0)),
        ),
        compiler_params=pltpu.CompilerParams(dimension_semantics=("parallel",)),
    )(x, w, b, s)


# -----------------------------------------------------------------------------
# Kernel 3: fused two-operand output projection  o = tanh(q @ wq + c @ wc + b)
# (replaces concat([q, c]) @ w_out; no (M, 2H) glue tensor in HBM)
# -----------------------------------------------------------------------------
def _out_proj_kernel(q_ref, c_ref, wq_ref, wc_ref, b_ref, o_ref):
    bt, T, H = q_ref.shape
    N = wq_ref.shape[1]
    acc = jnp.dot(q_ref[...].reshape(bt * T, H), wq_ref[...],
                  preferred_element_type=jnp.float32)
    acc = acc + jnp.dot(c_ref[...].reshape(bt * T, H), wc_ref[...],
                        preferred_element_type=jnp.float32)
    o_ref[...] = jnp.tanh(acc.reshape(bt, T, N) + b_ref[...]).astype(o_ref.dtype)


def output_projection(q_bth, c_bth, wq, wc, b, *, out_dtype=jnp.float32):
    B, T, H = q_bth.shape
    N = wq.shape[1]
    bt = _pick_batch_tile(B, T)
    q = q_bth.astype(jnp.bfloat16)
    c = c_bth.astype(jnp.bfloat16)
    wq = wq.astype(jnp.bfloat16)
    wc = wc.astype(jnp.bfloat16)
    b = b.astype(jnp.float32)
    return pl.pallas_call(
        _out_proj_kernel,
        out_shape=jax.ShapeDtypeStruct((B, T, N), out_dtype),
        grid_spec=pltpu.PrefetchScalarGridSpec(
            num_scalar_prefetch=0,
            grid=(B // bt,),
            in_specs=[
                pl.BlockSpec((bt, T, H), lambda i: (i, 0, 0)),
                pl.BlockSpec((bt, T, H), lambda i: (i, 0, 0)),
                pl.BlockSpec((H, N), lambda i: (0, 0)),
                pl.BlockSpec((H, N), lambda i: (0, 0)),
                pl.BlockSpec((1, N), lambda i: (0, 0)),
            ],
            out_specs=pl.BlockSpec((bt, T, N), lambda i: (i, 0, 0)),
        ),
        compiler_params=pltpu.CompilerParams(dimension_semantics=("parallel",)),
    )(q, c, wq, wc, b)


# -----------------------------------------------------------------------------
# Kernel 4: global (Luong dot) attention, batched over bt batch elements per step.
#   q: (B, Td, H) bf16   m: (B, S, H) bf16 (S padded to 128-multiple)   lengths i32
# Outputs: attn (B, Td, S) bf16 (lane-dense stores), ctx (B, Td, H) bf16.
# -----------------------------------------------------------------------------
def _attention_kernel(len_ref, q_ref, m_ref, attn_ref, ctx_ref, *, exact_softmax):
    q = q_ref[...]                                        # (bt, Td, H)
    m = m_ref[...]                                        # (bt, S, H)
    s = jnp.einsum("btd,bsd->bts", q, m, preferred_element_type=jnp.float32)
    col = jax.lax.broadcasted_iota(jnp.int32, s.shape, 2)
    s = jnp.where(col < len_ref[...], s, -1e30)           # finite mask: (bt,1,1) bcast
    mx = jnp.max(s, axis=-1, keepdims=True)
    p = jnp.exp(s - mx)
    # denom >= 1 always (the row max contributes exp(0)=1, even for length 0),
    # so the reciprocal is safe.
    denom = jnp.sum(p, axis=-1, keepdims=True)
    if exact_softmax:
        attn = p / denom
    else:
        attn = p * pl.reciprocal(denom, approx=True)      # EUP slot, ~free
    attn_ref[...] = attn.astype(attn_ref.dtype)
    ctx = jnp.einsum("bts,bsd->btd", attn.astype(m.dtype), m,
                     preferred_element_type=jnp.float32)
    ctx_ref[...] = ctx.astype(ctx_ref.dtype)


def global_attention(q_bth, m_bsh, lengths, *, exact_softmax=False):
    B, Td, H = q_bth.shape
    _, S, _ = m_bsh.shape
    bt = _pick_attn_tile(B)
    # TODO(synk): for long Td/S on v7x (64 MiB VMEM) add a Td tile axis and cap bt so
    # 2*(bt*S*H*2 + bt*Td*S*2 + bt*Td*H*4) stays well under the scoped budget.
    q = q_bth.astype(jnp.bfloat16)
    m = m_bsh.astype(jnp.bfloat16)
    ln3 = lengths.astype(jnp.int32).reshape(B, 1, 1)
    kernel = functools.partial(_attention_kernel, exact_softmax=exact_softmax)
    attn, ctx = pl.pallas_call(
        kernel,
        out_shape=(
            jax.ShapeDtypeStruct((B, Td, S), jnp.bfloat16),   # bf16 writeback
            jax.ShapeDtypeStruct((B, Td, H), jnp.bfloat16),
        ),
        grid_spec=pltpu.PrefetchScalarGridSpec(
            num_scalar_prefetch=0,
            grid=(B // bt,),
            in_specs=[
                pl.BlockSpec((bt, 1, 1), lambda i: (i, 0, 0)),
                pl.BlockSpec((bt, Td, H), lambda i: (i, 0, 0)),
                pl.BlockSpec((bt, S, H), lambda i: (i, 0, 0)),
            ],
            out_specs=[
                pl.BlockSpec((bt, Td, S), lambda i: (i, 0, 0)),
                pl.BlockSpec((bt, Td, H), lambda i: (i, 0, 0)),
            ],
        ),
        compiler_params=pltpu.CompilerParams(dimension_semantics=("parallel",)),
    )(ln3, q, m)
    return attn, ctx


# -----------------------------------------------------------------------------
# NMT model (encoder + attention decoder) built on the kernels above.
# -----------------------------------------------------------------------------
class NMTModelPallas:
    def __init__(self, vocab, emb_dim, hidden, key):
        ks = jax.random.split(key, 6)
        s = 0.1
        bf = jnp.bfloat16
        self.params = {
            "src_emb": (s * jax.random.normal(ks[0], (vocab, emb_dim))).astype(bf),
            "tgt_emb": (s * jax.random.normal(ks[1], (vocab, emb_dim))).astype(bf),
            "w_enc": (s * jax.random.normal(ks[2], (emb_dim, hidden))).astype(bf),
            "b_enc": jnp.zeros((1, hidden), jnp.float32),
            "w_dec": (s * jax.random.normal(ks[3], (emb_dim, hidden))).astype(bf),
            "b_dec": jnp.zeros((1, hidden), jnp.float32),
            "w_out_q": (s * jax.random.normal(ks[4], (hidden, hidden))).astype(bf),
            "w_out_c": (s * jax.random.normal(ks[5], (hidden, hidden))).astype(bf),
            "b_out": jnp.zeros((1, hidden), jnp.float32),
        }
        self.hidden = hidden
        self._dec_state = None      # set by decoder init_state
        self._src_len = None        # original (unpadded) source length

    # ---- encoder: embedding gather + fused dense/masked-sum (Pallas) ----------
    def _encoder(self, src, lengths):
        p = self.params
        Ls, B = src.shape
        self._src_len = Ls
        # TODO(synk): the embedding gather could be fused into the dense kernel via
        # scalar-prefetched token ids + a pl.Element row-gather BlockSpec.
        emb = jnp.take(p["src_emb"], src.T, axis=0)            # (B, Ls, E) bf16
        memory_bank, sums = encoder_dense(emb, p["w_enc"], p["b_enc"], lengths)
        enc_state = sums / jnp.maximum(lengths.astype(jnp.float32), 1.0)[:, None]
        # Pad the source axis AFTER the dense (one cheap bf16 pass) so the attention
        # weight output is lane-dense; padded positions are masked by `lengths`.
        S = _round_up(max(Ls, 1), 128)
        if S != Ls:
            memory_bank = jnp.pad(memory_bank, ((0, 0), (0, S - Ls), (0, 0)))
        return enc_state, memory_bank, lengths

    # ---- decoder -------------------------------------------------------------
    def _decoder_init_state(self, src, memory_bank, enc_state):
        self._dec_state = enc_state                            # (B, H)

    def _decoder(self, dec_in, memory_bank, memory_lengths, with_align=False,
                 teacher_outputs=None):
        # TODO(synk): teacher_outputs / with_align alter the OpenNMT decoder path;
        # not modeled for this synthetic decoder.
        p = self.params
        Td, B = dec_in.shape

        emb = jnp.take(p["tgt_emb"], dec_in.T, axis=0)         # (B, Td, E) bf16
        # fused dense + tanh with per-batch init-state injection (Pallas)
        query = decoder_query(emb, p["w_dec"], p["b_dec"], self._dec_state)   # (B,Td,H)

        # masked-softmax attention + context (Pallas), batch-major, bf16 writeback
        attn_b, ctx_b = global_attention(query, memory_bank, memory_lengths)

        # fused output projection: tanh(q @ Wq + ctx @ Wc + b)  (Pallas, no concat)
        dec2 = output_projection(query, ctx_b, p["w_out_q"], p["w_out_c"],
                                 p["b_out"], out_dtype=jnp.float32)           # (B,Td,H)

        dec_out = jnp.transpose(dec2, (1, 0, 2))                              # (Td,B,H)
        attn_std = jnp.transpose(
            attn_b[:, :, : self._src_len].astype(jnp.float32), (1, 0, 2))     # (Td,B,Ls)
        return dec_out, {"std": attn_std}

    # ---- NMTmodel.forward equivalent ----------------------------------------
    def forward(self, src, tgt, lengths, **kwargs):
        dec_in = tgt[:-1]
        enc_state, memory_bank, lengths = self._encoder(src, lengths)
        with_align = kwargs["with_align"]
        if kwargs["bptt"] is False:
            self._decoder_init_state(src, memory_bank, enc_state)
        if kwargs.get("teacher_outputs") is not None:
            dec_out, attns = self._decoder(
                dec_in, memory_bank, memory_lengths=lengths, with_align=with_align,
                teacher_outputs=kwargs["teacher_outputs"])
        else:
            dec_out, attns = self._decoder(
                dec_in, memory_bank, memory_lengths=lengths, with_align=with_align)
        return dec_out, attns


if __name__ == "__main__":
    VOCAB, EMB, HIDDEN = 16, 128, 128        # lane-dense (128-aligned) feature dims
    SRC_LEN, TGT_LEN, BATCH = 8, 9, 2

    key = jax.random.PRNGKey(0)
    k_model, k_src, k_tgt = jax.random.split(key, 3)

    model = NMTModelPallas(VOCAB, EMB, HIDDEN, k_model)

    src = jax.random.randint(k_src, (SRC_LEN, BATCH), 0, VOCAB, dtype=jnp.int32)
    tgt = jax.random.randint(k_tgt, (TGT_LEN, BATCH), 0, VOCAB, dtype=jnp.int32)
    lengths = jnp.array([SRC_LEN, 5], dtype=jnp.int32)

    dec_out, attns = model.forward(
        src, tgt, lengths, bptt=False, with_align=False, teacher_outputs=None
    )
    jax.block_until_ready(dec_out)
    jax.block_until_ready(attns["std"])

    assert dec_out.shape == (TGT_LEN - 1, BATCH, HIDDEN)
    assert attns["std"].shape == (TGT_LEN - 1, BATCH, SRC_LEN)
    assert bool(jnp.all(jnp.isfinite(dec_out)))
    assert bool(jnp.all(jnp.isfinite(attns["std"])))
    print("KERNEL_OK")
</pallas_src>

<mosaic_0001>
module attributes {stable_mosaic.version = 11 : i64} {
  func.func @_enc_dense_kernel(%arg0: i32, %arg1: memref<2x1x1xi32, #tpu.memory_space<vmem>>, %arg2: memref<2x8x128xbf16, #tpu.memory_space<vmem>>, %arg3: memref<128x128xbf16, #tpu.memory_space<vmem>>, %arg4: memref<1x128xf32, #tpu.memory_space<vmem>>, %arg5: memref<2x8x128xbf16, #tpu.memory_space<vmem>>, %arg6: memref<2x1x128xf32, #tpu.memory_space<vmem>>) attributes {dimension_semantics = [#tpu.dimension_semantics<parallel>], iteration_bounds = array<i64: 1>, scalar_prefetch = 0 : i64, scratch_operands = 0 : i64, tpu.core_type = #tpu.core_type<tc>, window_params = [{transform_indices = @transform_0, window_bounds = array<i64: 2, 1, 1>}, {transform_indices = @transform_1, window_bounds = array<i64: 2, 8, 128>}, {pipeline_mode = #tpu.pipeline_mode<synchronous>, transform_indices = @transform_2, window_bounds = array<i64: 128, 128>}, {pipeline_mode = #tpu.pipeline_mode<synchronous>, transform_indices = @transform_3, window_bounds = array<i64: 1, 128>}, {transform_indices = @transform_4, window_bounds = array<i64: 2, 8, 128>}, {transform_indices = @transform_5, window_bounds = array<i64: 2, 1, 128>}]} {
    %c0 = arith.constant 0 : index
    %c0_0 = arith.constant 0 : index
    %c0_1 = arith.constant 0 : index
    %0 = vector.load %arg2[%c0, %c0_0, %c0_1] : memref<2x8x128xbf16, #tpu.memory_space<vmem>>, vector<2x8x128xbf16>
    %1 = vector.shape_cast %0 : vector<2x8x128xbf16> to vector<16x128xbf16>
    %c0_2 = arith.constant 0 : index
    %c0_3 = arith.constant 0 : index
    %2 = vector.load %arg3[%c0_2, %c0_3] : memref<128x128xbf16, #tpu.memory_space<vmem>>, vector<128x128xbf16>
    %cst = arith.constant dense<0.000000e+00> : vector<16x128xf32>
    %3 = tpu.matmul %1, %2, %cst {dimension_numbers = #tpu.dot_dimension_numbers<[1], [0], [0], [1], [0, 0, 1, 1], [], []>} : vector<16x128xbf16>, vector<128x128xbf16>, vector<16x128xf32> -> vector<16x128xf32>
    %4 = vector.shape_cast %3 : vector<16x128xf32> to vector<2x8x128xf32>
    %c0_4 = arith.constant 0 : index
    %c0_5 = arith.constant 0 : index
    %5 = vector.load %arg4[%c0_4, %c0_5] : memref<1x128xf32, #tpu.memory_space<vmem>>, vector<1x128xf32>
    %6 = vector.shape_cast %5 : vector<1x128xf32> to vector<1x1x128xf32>
    %7 = vector.broadcast %6 : vector<1x1x128xf32> to vector<2x8x128xf32>
    %8 = arith.addf %4, %7 : vector<2x8x128xf32>
    %9 = math.tanh %8 : vector<2x8x128xf32>
    %10 = arith.truncf %9 : vector<2x8x128xf32> to vector<2x8x128xbf16>
    %c0_6 = arith.constant 0 : index
    %c0_7 = arith.constant 0 : index
    %c0_8 = arith.constant 0 : index
    %11 = vector.load %arg5[%c0_6, %c0_7, %c0_8] : memref<2x8x128xbf16, #tpu.memory_space<vmem>>, vector<2x8x128xbf16>
    tpu.vector_store %arg5[%c0_6, %c0_7, %c0_8], %10 {strides = array<i32>} : memref<2x8x128xbf16, #tpu.memory_space<vmem>>, vector<2x8x128xbf16>,
    %12 = tpu.iota {dimensions = array<i32: 1>} : vector<2x8x1xi32>
    %c0_9 = arith.constant 0 : index
    %c0_10 = arith.constant 0 : index
    %c0_11 = arith.constant 0 : index
    %13 = vector.load %arg1[%c0_9, %c0_10, %c0_11] : memref<2x1x1xi32, #tpu.memory_space<vmem>>, vector<2x1x1xi32>
    %14 = vector.broadcast %13 : vector<2x1x1xi32> to vector<2x8x1xi32>
    %15 = arith.cmpi slt, %12, %14 : vector<2x8x1xi32>
    %16 = arith.extui %15 : vector<2x8x1xi1> to vector<2x8x1xi32>
    %17 = arith.sitofp %16 : vector<2x8x1xi32> to vector<2x8x1xf32>
    %18 = vector.broadcast %17 : vector<2x8x1xf32> to vector<2x8x128xf32>
    %19 = arith.mulf %9, %18 : vector<2x8x128xf32>
    %cst_12 = arith.constant dense<0.000000e+00> : vector<2x128xf32>
    %20 = vector.multi_reduction <add>, %19, %cst_12 [1] : vector<2x8x128xf32> to vector<2x128xf32>
    %21 = vector.shape_cast %20 : vector<2x128xf32> to vector<2x1x128xf32>
    %c0_13 = arith.constant 0 : index
    %c0_14 = arith.constant 0 : index
    %c0_15 = arith.constant 0 : index
    %22 = vector.load %arg6[%c0_13, %c0_14, %c0_15] : memref<2x1x128xf32, #tpu.memory_space<vmem>>, vector<2x1x128xf32>
    tpu.vector_store %arg6[%c0_13, %c0_14, %c0_15], %21 {strides = array<i32>} : memref<2x1x128xf32, #tpu.memory_space<vmem>>, vector<2x1x128xf32>,
    return
  }
  func.func @transform_0(%arg0: i32) -> (i32, i32, i32) {
    %c0_i32 = arith.constant 0 : i32
    %c0_i32_0 = arith.constant 0 : i32
    %c0_i32_1 = arith.constant 0 : i32
    return %arg0, %c0_i32, %c0_i32_0 : i32, i32, i32
  }
  func.func @transform_1(%arg0: i32) -> (i32, i32, i32) {
    %c0_i32 = arith.constant 0 : i32
    %c0_i32_0 = arith.constant 0 : i32
    %c0_i32_1 = arith.constant 0 : i32
    return %arg0, %c0_i32, %c0_i32_0 : i32, i32, i32
  }
  func.func @transform_2(%arg0: i32) -> (i32, i32) {
    %c0_i32 = arith.constant 0 : i32
    %c0_i32_0 = arith.constant 0 : i32
    %c0_i32_1 = arith.constant 0 : i32
    return %c0_i32, %c0_i32_0 : i32, i32
  }
  func.func @transform_3(%arg0: i32) -> (i32, i32) {
    %c0_i32 = arith.constant 0 : i32
    %c0_i32_0 = arith.constant 0 : i32
    %c0_i32_1 = arith.constant 0 : i32
    return %c0_i32, %c0_i32_0 : i32, i32
  }
  func.func @transform_4(%arg0: i32) -> (i32, i32, i32) {
    %c0_i32 = arith.constant 0 : i32
    %c0_i32_0 = arith.constant 0 : i32
    %c0_i32_1 = arith.constant 0 : i32
    return %arg0, %c0_i32, %c0_i32_0 : i32, i32, i32
  }
  func.func @transform_5(%arg0: i32) -> (i32, i32, i32) {
    %c0_i32 = arith.constant 0 : i32
    %c0_i32_0 = arith.constant 0 : i32
    %c0_i32_1 = arith.constant 0 : i32
    return %arg0, %c0_i32, %c0_i32_0 : i32, i32, i32
  }
}

</mosaic_0001>

<bundles_post_ra>
// kernel: tpu_custom_call.1
= control target key start
LH: loop header
LB: loop body
LE: loop exit
PB: predicated region body
PF: predicated region fallthrough
CT: control target
= control target key end

     0   :  { %11 = vsyncpa [#allocation3], 0  ;;  %s493_s0 = inlined_call_operand.vmem [shape: s32[2,1,1], index: 0, kind: input, shape index: {}]   ;;  %s494_s1 = inlined_call_operand.hbm [shape: bf16[2,8,128], index: 1, kind: input, shape index: {}]   ;;  %s495_s2 = inlined_call_operand.hbm [shape: bf16[128,128], index: 2, kind: input, shape index: {}]   ;;  %s496_s3 = inlined_call_operand.vmem [shape: f32[1,128], index: 3, kind: input, shape index: {}]   ;;  %s497_s4 = inlined_call_operand.hbm [shape: bf16[2,8,128], index: 4, kind: output, shape index: {0}]   ;;  %s498_s5 = inlined_call_operand.hbm [shape: f32[2,1,128], index: 5, kind: output, shape index: {1}]  }
   0x1   :  { %12 = vsyncpa [#allocation6], 0 }
   0x2   :  { %13 = vsyncpa [#allocation4], 0 }
   0x3   :  { %14 = vsyncpa [#allocation9], 0  ;;  %s422_s18 = smov [#allocation2]  }
   0x4   :  { %s22_s19 = sshll.u32 %s422_s18, 4  ;;  %s23_s19 = int_to_ptr.vmem [resolvable:$true] %s22_s19 }
   0x5   :  { %s342_s20 = scalar_lea.vmem %s23_s19, 128  ;;  %p347_p1 = scmp.lt.s32.totalorder %s23_s19, %s23_s19 }
   0x6   :  { %p343_p0 = scmp.ne.s32.totalorder %s23_s19, %s342_s20  ;;  %p348_p2 = scmp.lt.s32.totalorder %s342_s20, %s342_s20 }
   0x8   :  { %p349_p3 = por %p348_p2, %p347_p1 }
   0xa   :  { %p350_p4 = pnand %p349_p3, %p343_p0 }
   0xc   :  { %353 = shalt.err (!%p350_p4)
}
   0xd   :  { %s423_s21 = smov 64   ;;  %s424_s22 = smov 4  }
   0xe   :  { %28 = dma.hbm_to_vmem [thread:$0]  %s494_s1, 128, %s23_s19, [#allocation3], %s423_s21, %s423_s21, %s424_s22  }
   0xf   :  { %s425_s25 = smov [#allocation5]  }
  0x10   :  { %s34_s26 = sshll.u32 %s425_s25, 4  ;;  %s35_s26 = int_to_ptr.vmem [resolvable:$true] %s34_s26 }
  0x11   :  { %s362_s27 = scalar_lea.vmem %s35_s26, 1024  ;;  %p367_p6 = scmp.lt.s32.totalorder %s35_s26, %s35_s26 }
  0x12   :  { %p363_p5 = scmp.ne.s32.totalorder %s35_s26, %s362_s27  ;;  %p368_p7 = scmp.lt.s32.totalorder %s362_s27, %s362_s27 }
  0x14   :  { %p369_p8 = por %p368_p7, %p367_p6 }
  0x16   :  { %p370_p9 = pnand %p369_p8, %p363_p5 }
  0x18   :  { %373 = shalt.err (!%p370_p9)
}
  0x19   :  { %40 = dma.hbm_to_vmem [thread:$0]  %s495_s2, 1024, %s35_s26, [#allocation6], %s423_s21, %s423_s21, %s424_s22  }
  0x1a   :  { %414 = dma.done.wait [#allocation3], 128  }
  0x1b   :  { %415 = vsyncadd [#allocation3], 4294967168 }
  0x1c   :  { %416 = dma.done.wait [#allocation6], 1024  }
  0x1d   :  { %417 = vsyncadd [#allocation6], 4294966272  ;;  %v426_v0 = vmov 0.0   ;;  %vm427_vm0 = vmmov 0   ;;  %v428_v1 = vmov 0   ;;  %v321_v2 = vld [vmem:[#allocation5 + $0x38] sm:$0xff]   ;;  %v178_v4 = vlaneseq }
  0x1e   :  { %284 = vmatprep.subr.bf16.mxu0 %v426_v0  ;;  %300 = vmatprep.mubr.msk.bf16.mxu0 %vm427_vm0, %v426_v0  ;;  %v322_v3 = vld [vmem:[#allocation5 + $0x30] sm:$0xff]   ;;  %v323_v5 = vld [vmem:[#allocation5 + $0x28] sm:$0xff]   ;;  %v266_v7 = vld [vmem:[%s493_s0] ss:$0 sm:$0xff]  ;;  %s429_s8 = smov [#allocation7]  }
  0x1f   :  { %315 = vset.pattern.permute.xlu0 %v428_v1  ;;  %285 = vmatpush3.bf16.msra.mxu0 %v321_v2  ;;  %v179_v6 = vshrl.u32 %v178_v4, 7  ;;  %v267_v8 = vld [vmem:[%s493_s0 + $0x1] ss:$0 sm:$0xff]  ;;  %v324_v9 = vld [vmem:[#allocation5 + $0x20] sm:$0xff]   ;;  %v326_v14 = vld [vmem:[#allocation5 + $0x10] sm:$0xff]   ;;  %s227_s9 = sshll.u32 %s429_s8, 4  ;;  %s228_s9 = int_to_ptr.vmem [resolvable:$true] %s227_s9 }
  0x20   :  { %286 = vmatprep.subr.bf16.mxu0 %v426_v0  ;;  %v325_v13 = vld [vmem:[#allocation5 + $0x18] sm:$0xff]   ;;  %v327_v15 = vld [vmem:[#allocation5 + $0x8] sm:$0xff]   ;;  %v328_v16 = vld [vmem:[#allocation5] sm:$0xff]   ;;  %p379_p11 = scmp.lt.s32.totalorder %s228_s9, %s228_s9 }
  0x21   :  { %vm190_vm1 = vcmp.lt.s32.totalorder %v179_v6, %v266_v7  ;;  %vm191_vm2 = vcmp.lt.s32.totalorder %v179_v6, %v267_v8  ;;  %v329_v17 = vld [vmem:[#allocation2] sm:$0xff]  }
  0x22   :  { %v268_v10 = vsel %vm190_vm1, 1.0, %v426_v0  ;;  %v269_v11 = vsel %vm191_vm2, 1.0, %v426_v0  ;;  %v265_v18 = vld [vmem:[%s496_s3] ss:$0 sm:$0xff]  ;;  %s374_s3 = scalar_lea.vmem %s228_s9, 128 }
  0x23   :  { %287 = vmatpush3.bf16.msra.mxu0 %v322_v3  ;;  %v316_v12 = vpack.i.bf16 %v269_v11, %v268_v10  ;;  %p375_p10 = scmp.ne.s32.totalorder %s228_s9, %s374_s3  ;;  %p380_p12 = scmp.lt.s32.totalorder %s374_s3, %s374_s3 }
  0x24   :  { %288 = vmatprep.subr.bf16.mxu0 %v426_v0 }
  0x25   :  { %317 = vperm.xlu0 %315, %v316_v12   ;;  %p381_p13 = por %p380_p12, %p379_p11 }
  0x27   :  { %289 = vmatpush3.bf16.msra.mxu0 %v323_v5  ;;  %p382_p0 = pnand %p381_p13, %p375_p10 }
  0x28   :  { %290 = vmatprep.subr.bf16.mxu0 %v426_v0 }
  0x2b   :  { %291 = vmatpush3.bf16.msra.mxu0 %v324_v9 }
  0x2c   :  { %292 = vmatprep.subr.bf16.mxu0 %v426_v0 }
  0x2f   :  { %293 = vmatpush3.bf16.msra.mxu0 %v325_v13 }
  0x30   :  { %294 = vmatprep.subr.bf16.mxu0 %v426_v0 }
  0x33   :  { %295 = vmatpush3.bf16.msra.mxu0 %v326_v14 }
  0x34   :  { %296 = vmatprep.subr.bf16.mxu0 %v426_v0 }
  0x37   :  { %297 = vmatpush3.bf16.msra.mxu0 %v327_v15 }
  0x38   :  { %298 = vmatprep.subr.bf16.mxu0 %v426_v0 }
  0x3b   :  { %299 = vmatpush3.bf16.msra.mxu0 %v328_v16 }
  0x3e   :  { %301 = vmatmul.mubr.bf16.vlgmr.msra.gmra.mxu0 %v329_v17 }
  0xa0   :  { %v318_v25 = vpop.permute.xlu0 %317 }
  0xa1   :  { %v319_v26 = vunpack.i.l.bf16 %v318_v25  ;;  %v320_v28 = vunpack.i.h.bf16 %v318_v25 }
  0xfe   :  { %v156_v19 = vpop.f32.mrf.mxu0 }
  0xff   :  { %v170_v20 = vadd.f32 %v265_v18, %v156_v19 }
 0x100   :  { %v302_v21 = vpop.f32.mrf.mxu0 }
 0x101   :  { %330 = vtanh.f32 %v170_v20 }
 0x102   :  { %v159_v22 = vpop.f32.mrf.mxu0 }
 0x103   :  { %v171_v23 = vadd.f32 %v265_v18, %v159_v22 }
 0x104   :  { %v303_v24 = vpop.f32.mrf.mxu0 }
 0x105   :  { %332 = vtanh.f32 %v171_v23 }
 0x10e   :  { %v331_v27 = vpop.eup %330 }
 0x10f   :  { %v206_v29 = vmul.f32 %v331_v27, %v319_v26 }
 0x111   :  { %v208_v30 = vrot.slane %v206_v29, 4 }
 0x112   :  { %v333_v31 = vpop.eup %332 }
 0x113   :  { %v207_v32 = vmul.f32 %v333_v31, %v320_v28  ;;  %v209_v33 = vadd.f32 %v208_v30, %v206_v29  ;;  %v273_v34 = vpack.c.bf16 %v333_v31, %v331_v27 }
 0x115   :  { %v210_v35 = vrot.slane %v209_v33, 2  ;;  %v214_v36 = vrot.slane %v207_v32, 4  ;;  %274 = vst [vmem:[#allocation7] sm:$0xff] %v273_v34  }
 0x116   :  { %385 = shalt.err (!%p382_p0)
}
 0x117   :  { %233 = dma.vmem_to_hbm [thread:$0]  %s228_s9, 128, %s497_s4, [#allocation4], %s423_s21, %s423_s21, %s424_s22   ;;  %v211_v37 = vadd.f32 %v210_v35, %v209_v33  ;;  %v215_v38 = vadd.f32 %v214_v36, %v207_v32 }
 0x118   :  { %s430_s12 = smov [#allocation8]  }
 0x119   :  { %v212_v39 = vrot.slane %v211_v37, 1  ;;  %v216_v40 = vrot.slane %v215_v38, 2  ;;  %s239_s13 = sshll.u32 %s430_s12, 4  ;;  %s240_s13 = int_to_ptr.vmem [resolvable:$true] %s239_s13 }
 0x11a   :  { %s394_s14 = scalar_lea.vmem %s240_s13, 32  ;;  %p399_p2 = scmp.lt.s32.totalorder %s240_s13, %s240_s13 }
 0x11b   :  { %v213_v41 = vadd.f32 %v212_v39, %v211_v37  ;;  %v217_v42 = vadd.f32 %v216_v40, %v215_v38  ;;  %p395_p1 = scmp.ne.s32.totalorder %s240_s13, %s394_s14  ;;  %p400_p3 = scmp.lt.s32.totalorder %s394_s14, %s394_s14 }
 0x11d   :  { %v218_v43 = vrot.slane %v217_v42, 1  ;;  %220 = vst [vmem:[#allocation8] sm:$0x1] %v213_v41  ;;  %p401_p4 = por %p400_p3, %p399_p2 }
 0x11f   :  { %v219_v44 = vadd.f32 %v218_v43, %v217_v42  ;;  %p402_p5 = pnand %p401_p4, %p395_p1 }
 0x121   :  { %221 = vst [vmem:[#allocation8 + $0x1] sm:$0x1] %v219_v44 }
 0x122   :  { %405 = shalt.err (!%p402_p5)
}
 0x123   :  { %s431_s4 = smov 16   ;;  %s432_s15 = smov 1  }
 0x124   :  { %245 = dma.vmem_to_hbm [thread:$0]  %s240_s13, 32, %s498_s5, [#allocation9], %s431_s4, %s431_s4, %s432_s15  }
 0x125   :  { %418 = dma.done.wait [#allocation4], 128  }
 0x126   :  { %419 = vsyncadd [#allocation4], 4294967168 }
 0x127   :  { %420 = dma.done.wait [#allocation9], 32  }
 0x128   :  { %421 = vsyncadd [#allocation9], 4294967264 }
 0x129   :  { %252 = vsyncpa [#allocation3], 1 }
 0x12a   :  { %253 = vsyncpa [#allocation6], 1 }
 0x12b   :  { %254 = vsyncpa [#allocation4], 1 }
 0x12c   :  { %255 = vsyncpa [#allocation9], 1 }

</bundles_post_ra>
